<compile_context>
chip_gen: v7x
topology: tpu7x:2x2x1
jax: 0.10.0
libtpu: 0.0.40
codegen_flags: <defaults>
</compile_context>

<pallas_src>
import functools

import jax
import jax.numpy as jnp
from jax.experimental import pallas as pl
from jax.experimental.pallas import tpu as pltpu

INPUT_SIZE = 11
HIDDEN_SIZE = 256
OUTPUT_SIZE = 3
K_PAD = 16    # fc1 input dim: 11 features + 1 ones-column (bias) + 4 zero pad
N_PAD = 128   # fc3 output dim padded to one full lane width


def _round_up(x, m):
    return (x + m - 1) // m * m


def dqn_kernel(x_ref, w1_ref, w2_ref, b2_ref, w3_ref, b3_ref, o_ref):
    """Fused 3-layer MLP for one batch tile. Weights are VMEM-resident."""
    x = x_ref[...]                                    # (TM, 16) f32, col 11 == 1.0

    # fc1 + ReLU. fc1 bias is folded into row 11 of w1 via the ones column.
    h1 = jnp.dot(x, w1_ref[...].astype(jnp.float32),
                 preferred_element_type=jnp.float32)
    h1 = jnp.maximum(h1, 0.0)                         # (TM, 256) f32

    # fc2 + ReLU: bf16 MXU inputs, f32 accumulation / bias add / ReLU on VPU.
    h2 = jnp.dot(h1.astype(jnp.bfloat16), w2_ref[...],
                 preferred_element_type=jnp.float32) + b2_ref[...]
    h2 = jnp.maximum(h2, 0.0)                         # (TM, 256) f32

    # fc3 (padded to 128 lanes -> single unmasked lane-dense store).
    out = jnp.dot(h2.astype(jnp.bfloat16), w3_ref[...],
                  preferred_element_type=jnp.float32) + b3_ref[...]
    o_ref[...] = out                                  # (TM, 128) f32


def init_params(key, input_size=INPUT_SIZE, hidden_size=HIDDEN_SIZE,
                output_size=OUTPUT_SIZE):
    """PyTorch nn.Linear-style init: U(-1/sqrt(fan_in), 1/sqrt(fan_in)).
    Weights stored as (in_features, out_features) so forward is x @ W + b,
    identical to PyTorch's x @ W.T with W of shape (out, in)."""
    def linear(k, fan_in, fan_out):
        kw, kb = jax.random.split(k)
        bound = 1.0 / jnp.sqrt(fan_in)
        w = jax.random.uniform(kw, (fan_in, fan_out), jnp.float32, -bound, bound)
        b = jax.random.uniform(kb, (1, fan_out), jnp.float32, -bound, bound)
        return w, b

    k1, k2, k3 = jax.random.split(key, 3)
    w1, b1 = linear(k1, input_size, hidden_size)
    w2, b2 = linear(k2, hidden_size, hidden_size)
    w3, b3 = linear(k3, hidden_size, output_size)
    return (w1, b1, w2, b2, w3, b3)


def prepare_params(params, input_size=INPUT_SIZE, hidden_size=HIDDEN_SIZE,
                   output_size=OUTPUT_SIZE, k_pad=K_PAD, n_pad=N_PAD):
    """One-time repack: bf16 weights, fc1 bias folded into a padded K dim,
    fc3 zero-padded to a lane-dense 128-wide output."""
    w1, b1, w2, b2, w3, b3 = params

    w1p = jnp.zeros((k_pad, hidden_size), jnp.float32)
    w1p = w1p.at[:input_size, :].set(w1)
    w1p = w1p.at[input_size, :].set(b1.reshape(-1))        # bias row (ones column)
    w1p = w1p.astype(jnp.bfloat16)

    w2b = w2.astype(jnp.bfloat16)
    b2f = b2.reshape(1, hidden_size).astype(jnp.float32)

    w3p = jnp.zeros((hidden_size, n_pad), jnp.float32)
    w3p = w3p.at[:, :output_size].set(w3).astype(jnp.bfloat16)
    b3p = jnp.zeros((1, n_pad), jnp.float32)
    b3p = b3p.at[:, :output_size].set(b3.reshape(1, -1))

    return (w1p, w2b, b2f, w3p, b3p)


@functools.partial(jax.jit, static_argnames=("tm",))
def dqn_forward(x, prepared, *, tm=256):
    w1p, w2, b2, w3p, b3p = prepared
    B, K = x.shape
    H = w2.shape[0]

    # Fold the fc1 bias via a ones column and zero-pad K (11 -> 16).
    x = x.astype(jnp.float32)
    ones = jnp.ones((B, 1), jnp.float32)
    zeros = jnp.zeros((B, K_PAD - K - 1), jnp.float32)
    x_pad = jnp.concatenate([x, ones, zeros], axis=1)       # (B, 16)

    # Batch tiling: 256-row tiles for large (training) batches, a single
    # sublane-rounded tile for small act() batches.
    tm_eff = tm if B >= tm else _round_up(B, 8)
    b_pad = _round_up(B, tm_eff)
    if b_pad != B:
        x_pad = jnp.pad(x_pad, ((0, b_pad - B), (0, 0)))
    grid = (b_pad // tm_eff,)

    out = pl.pallas_call(
        dqn_kernel,
        out_shape=jax.ShapeDtypeStruct((b_pad, N_PAD), jnp.float32),
        grid_spec=pltpu.PrefetchScalarGridSpec(
            num_scalar_prefetch=0,
            grid=grid,
            in_specs=[
                pl.BlockSpec((tm_eff, K_PAD), lambda i: (i, 0)),   # x tile
                pl.BlockSpec((K_PAD, H), lambda i: (0, 0)),        # w1 (resident)
                pl.BlockSpec((H, H), lambda i: (0, 0)),            # w2 (resident)
                pl.BlockSpec((1, H), lambda i: (0, 0)),            # b2 (resident)
                pl.BlockSpec((H, N_PAD), lambda i: (0, 0)),        # w3 (resident)
                pl.BlockSpec((1, N_PAD), lambda i: (0, 0)),        # b3 (resident)
            ],
            out_specs=pl.BlockSpec((tm_eff, N_PAD), lambda i: (i, 0)),
        ),
        compiler_params=pltpu.CompilerParams(
            dimension_semantics=("parallel",)),
    )(x_pad, w1p, w2, b2, w3p, b3p)

    return out[:B, :OUTPUT_SIZE]


def reference_forward(x, params):
    """Pure-JAX f32 reference matching the PyTorch module semantics."""
    w1, b1, w2, b2, w3, b3 = params
    h1 = jnp.maximum(x @ w1 + b1, 0.0)
    h2 = jnp.maximum(h1 @ w2 + b2, 0.0)
    return h2 @ w3 + b3


if __name__ == "__main__":
    key = jax.random.PRNGKey(0)
    k_params, k_x, k_x_big = jax.random.split(key, 3)

    params = init_params(k_params)
    prepared = prepare_params(params)

    # Small act()-style batch.
    B = 8
    x = jax.random.normal(k_x, (B, INPUT_SIZE), jnp.float32)
    out = dqn_forward(x, prepared)
    jax.block_until_ready(out)
    ref = reference_forward(x, params)
    assert out.shape == (B, OUTPUT_SIZE)
    assert jnp.allclose(out, ref, atol=1e-2, rtol=1e-2), float(
        jnp.max(jnp.abs(out - ref)))

    # Replay-batch-sized forward exercising the batch-tiled grid (2 x 256 rows).
    B_big = 512
    x_big = jax.random.normal(k_x_big, (B_big, INPUT_SIZE), jnp.float32)
    out_big = dqn_forward(x_big, prepared)
    jax.block_until_ready(out_big)
    ref_big = reference_forward(x_big, params)
    assert out_big.shape == (B_big, OUTPUT_SIZE)
    assert jnp.allclose(out_big, ref_big, atol=1e-2, rtol=1e-2), float(
        jnp.max(jnp.abs(out_big - ref_big)))

    print("KERNEL_OK")
</pallas_src>

<mosaic_0001>
module attributes {stable_mosaic.version = 11 : i64} {
  func.func @dqn_kernel(%arg0: i32, %arg1: memref<8x16xf32, #tpu.memory_space<vmem>>, %arg2: memref<16x256xbf16, #tpu.memory_space<vmem>>, %arg3: memref<256x256xbf16, #tpu.memory_space<vmem>>, %arg4: memref<1x256xf32, #tpu.memory_space<vmem>>, %arg5: memref<256x128xbf16, #tpu.memory_space<vmem>>, %arg6: memref<1x128xf32, #tpu.memory_space<vmem>>, %arg7: memref<8x128xf32, #tpu.memory_space<vmem>>) attributes {dimension_semantics = [#tpu.dimension_semantics<parallel>], iteration_bounds = array<i64: 1>, scalar_prefetch = 0 : i64, scratch_operands = 0 : i64, tpu.core_type = #tpu.core_type<tc>, window_params = [{transform_indices = @transform_0, window_bounds = array<i64: 8, 16>}, {pipeline_mode = #tpu.pipeline_mode<synchronous>, transform_indices = @transform_1, window_bounds = array<i64: 16, 256>}, {pipeline_mode = #tpu.pipeline_mode<synchronous>, transform_indices = @transform_2, window_bounds = array<i64: 256, 256>}, {pipeline_mode = #tpu.pipeline_mode<synchronous>, transform_indices = @transform_3, window_bounds = array<i64: 1, 256>}, {pipeline_mode = #tpu.pipeline_mode<synchronous>, transform_indices = @transform_4, window_bounds = array<i64: 256, 128>}, {pipeline_mode = #tpu.pipeline_mode<synchronous>, transform_indices = @transform_5, window_bounds = array<i64: 1, 128>}, {transform_indices = @transform_6, window_bounds = array<i64: 8, 128>}]} {
    %c0 = arith.constant 0 : index
    %c0_0 = arith.constant 0 : index
    %0 = vector.load %arg1[%c0, %c0_0] : memref<8x16xf32, #tpu.memory_space<vmem>>, vector<8x16xf32>
    %c0_1 = arith.constant 0 : index
    %c0_2 = arith.constant 0 : index
    %1 = vector.load %arg2[%c0_1, %c0_2] : memref<16x256xbf16, #tpu.memory_space<vmem>>, vector<16x256xbf16>
    %2 = arith.extf %1 : vector<16x256xbf16> to vector<16x256xf32>
    %cst = arith.constant dense<0.000000e+00> : vector<8x256xf32>
    %3 = tpu.matmul %0, %2, %cst {dimension_numbers = #tpu.dot_dimension_numbers<[1], [0], [0], [1], [0, 0, 1, 1], [], []>} : vector<8x16xf32>, vector<16x256xf32>, vector<8x256xf32> -> vector<8x256xf32>
    %cst_3 = arith.constant 0.000000e+00 : f32
    %4 = vector.broadcast %cst_3 : f32 to vector<8x256xf32>
    %5 = arith.maximumf %3, %4 : vector<8x256xf32>
    %6 = arith.truncf %5 : vector<8x256xf32> to vector<8x256xbf16>
    %c0_4 = arith.constant 0 : index
    %c0_5 = arith.constant 0 : index
    %7 = vector.load %arg3[%c0_4, %c0_5] : memref<256x256xbf16, #tpu.memory_space<vmem>>, vector<256x256xbf16>
    %cst_6 = arith.constant dense<0.000000e+00> : vector<8x256xf32>
    %8 = tpu.matmul %6, %7, %cst_6 {dimension_numbers = #tpu.dot_dimension_numbers<[1], [0], [0], [1], [0, 0, 1, 1], [], []>} : vector<8x256xbf16>, vector<256x256xbf16>, vector<8x256xf32> -> vector<8x256xf32>
    %c0_7 = arith.constant 0 : index
    %c0_8 = arith.constant 0 : index
    %9 = vector.load %arg4[%c0_7, %c0_8] : memref<1x256xf32, #tpu.memory_space<vmem>>, vector<1x256xf32>
    %10 = vector.broadcast %9 : vector<1x256xf32> to vector<8x256xf32>
    %11 = arith.addf %8, %10 : vector<8x256xf32>
    %cst_9 = arith.constant 0.000000e+00 : f32
    %12 = vector.broadcast %cst_9 : f32 to vector<8x256xf32>
    %13 = arith.maximumf %11, %12 : vector<8x256xf32>
    %14 = arith.truncf %13 : vector<8x256xf32> to vector<8x256xbf16>
    %c0_10 = arith.constant 0 : index
    %c0_11 = arith.constant 0 : index
    %15 = vector.load %arg5[%c0_10, %c0_11] : memref<256x128xbf16, #tpu.memory_space<vmem>>, vector<256x128xbf16>
    %cst_12 = arith.constant dense<0.000000e+00> : vector<8x128xf32>
    %16 = tpu.matmul %14, %15, %cst_12 {dimension_numbers = #tpu.dot_dimension_numbers<[1], [0], [0], [1], [0, 0, 1, 1], [], []>} : vector<8x256xbf16>, vector<256x128xbf16>, vector<8x128xf32> -> vector<8x128xf32>
    %c0_13 = arith.constant 0 : index
    %c0_14 = arith.constant 0 : index
    %17 = vector.load %arg6[%c0_13, %c0_14] : memref<1x128xf32, #tpu.memory_space<vmem>>, vector<1x128xf32>
    %18 = vector.broadcast %17 : vector<1x128xf32> to vector<8x128xf32>
    %19 = arith.addf %16, %18 : vector<8x128xf32>
    %c0_15 = arith.constant 0 : index
    %c0_16 = arith.constant 0 : index
    %20 = vector.load %arg7[%c0_15, %c0_16] : memref<8x128xf32, #tpu.memory_space<vmem>>, vector<8x128xf32>
    tpu.vector_store %arg7[%c0_15, %c0_16], %19 {strides = array<i32>} : memref<8x128xf32, #tpu.memory_space<vmem>>, vector<8x128xf32>,
    return
  }
  func.func @transform_0(%arg0: i32) -> (i32, i32) {
    %c0_i32 = arith.constant 0 : i32
    %c0_i32_0 = arith.constant 0 : i32
    return %arg0, %c0_i32 : i32, i32
  }
  func.func @transform_1(%arg0: i32) -> (i32, i32) {
    %c0_i32 = arith.constant 0 : i32
    %c0_i32_0 = arith.constant 0 : i32
    %c0_i32_1 = arith.constant 0 : i32
    return %c0_i32, %c0_i32_0 : i32, i32
  }
  func.func @transform_2(%arg0: i32) -> (i32, i32) {
    %c0_i32 = arith.constant 0 : i32
    %c0_i32_0 = arith.constant 0 : i32
    %c0_i32_1 = arith.constant 0 : i32
    return %c0_i32, %c0_i32_0 : i32, i32
  }
  func.func @transform_3(%arg0: i32) -> (i32, i32) {
    %c0_i32 = arith.constant 0 : i32
    %c0_i32_0 = arith.constant 0 : i32
    %c0_i32_1 = arith.constant 0 : i32
    return %c0_i32, %c0_i32_0 : i32, i32
  }
  func.func @transform_4(%arg0: i32) -> (i32, i32) {
    %c0_i32 = arith.constant 0 : i32
    %c0_i32_0 = arith.constant 0 : i32
    %c0_i32_1 = arith.constant 0 : i32
    return %c0_i32, %c0_i32_0 : i32, i32
  }
  func.func @transform_5(%arg0: i32) -> (i32, i32) {
    %c0_i32 = arith.constant 0 : i32
    %c0_i32_0 = arith.constant 0 : i32
    %c0_i32_1 = arith.constant 0 : i32
    return %c0_i32, %c0_i32_0 : i32, i32
  }
  func.func @transform_6(%arg0: i32) -> (i32, i32) {
    %c0_i32 = arith.constant 0 : i32
    %c0_i32_0 = arith.constant 0 : i32
    return %arg0, %c0_i32 : i32, i32
  }
}

</mosaic_0001>

<bundles_post_ra>
// kernel: dqn_forward.1
= control target key start
LH: loop header
LB: loop body
LE: loop exit
PB: predicated region body
PF: predicated region fallthrough
CT: control target
= control target key end

     0   :  { %11 = vsyncpa [#allocation3], 0  ;;  %s853_s0 = inlined_call_operand.vmem [shape: f32[8,16], index: 0, kind: input, shape index: {}]   ;;  %s854_s1 = inlined_call_operand.vmem [shape: bf16[16,256], index: 1, kind: input, shape index: {}]   ;;  %s855_s2 = inlined_call_operand.hbm [shape: bf16[256,256], index: 2, kind: input, shape index: {}]   ;;  %s856_s3 = inlined_call_operand.vmem [shape: f32[1,256], index: 3, kind: input, shape index: {}]   ;;  %s857_s4 = inlined_call_operand.hbm [shape: bf16[256,128], index: 4, kind: input, shape index: {}]   ;;  %s858_s5 = inlined_call_operand.vmem [shape: f32[1,128], index: 5, kind: input, shape index: {}]   ;;  %s859_s6 = inlined_call_operand.vmem [shape: f32[8,128], index: 6, kind: output, shape index: {}]  }
   0x1   :  { %12 = vsyncpa [#allocation5], 0  ;;  %s769_s21 = smov [#allocation2]   ;;  %s721_s25 = scalar_lea.hbm %s855_s2, 4096 }
   0x2   :  { %s22_s22 = sshll.u32 %s769_s21, 4  ;;  %p722_p0 = scmp.ne.s32.totalorder %s855_s2, %s721_s25  ;;  %s23_s22 = int_to_ptr.vmem [resolvable:$true] %s22_s22 }
   0x3   :  { %p725_p1 = scmp.lt.u32.totalorder %s721_s25, %s855_s2 }
   0x5   :  { %p727_p2 = pnand %p725_p1, %p722_p0 }
   0x7   :  { %730 = shalt.err (!%p727_p2)
}
   0x8   :  { %s731_s30 = scalar_lea.vmem %s23_s22, 4096  ;;  %p736_p4 = scmp.lt.s32.totalorder %s23_s22, %s23_s22 }
   0x9   :  { %p732_p3 = scmp.ne.s32.totalorder %s23_s22, %s731_s30  ;;  %p737_p5 = scmp.lt.s32.totalorder %s731_s30, %s731_s30 }
   0xb   :  { %p738_p6 = por %p737_p5, %p736_p4 }
   0xd   :  { %p739_p7 = pnand %p738_p6, %p732_p3 }
   0xf   :  { %742 = shalt.err (!%p739_p7)
}
  0x10   :  { %s770_s7 = smov 128   ;;  %s771_s8 = smov 8  }
  0x11   :  { %28 = dma.hbm_to_vmem [thread:$0]  %s855_s2, 4096, %s23_s22, [#allocation3], %s770_s7, %s770_s7, %s771_s8  }
  0x12   :  { %s772_s11 = smov [#allocation4]   ;;  %s743_s15 = scalar_lea.hbm %s857_s4, 2048 }
  0x13   :  { %s36_s12 = sshll.u32 %s772_s11, 4  ;;  %p744_p8 = scmp.ne.s32.totalorder %s857_s4, %s743_s15  ;;  %s37_s12 = int_to_ptr.vmem [resolvable:$true] %s36_s12 }
  0x14   :  { %p747_p9 = scmp.lt.u32.totalorder %s743_s15, %s857_s4 }
  0x16   :  { %p749_p10 = pnand %p747_p9, %p744_p8 }
  0x18   :  { %752 = shalt.err (!%p749_p10)
}
  0x19   :  { %s753_s20 = scalar_lea.vmem %s37_s12, 2048  ;;  %p758_p12 = scmp.lt.s32.totalorder %s37_s12, %s37_s12 }
  0x1a   :  { %p754_p11 = scmp.ne.s32.totalorder %s37_s12, %s753_s20  ;;  %p759_p13 = scmp.lt.s32.totalorder %s753_s20, %s753_s20 }
  0x1c   :  { %p760_p0 = por %p759_p13, %p758_p12 }
  0x1e   :  { %p761_p1 = pnand %p760_p0, %p754_p11 }
  0x20   :  { %764 = shalt.err (!%p761_p1)
}
  0x21   :  { %s773_s2 = smov 64   ;;  %s774_s21 = smov 4  }
  0x22   :  { %42 = dma.hbm_to_vmem [thread:$0]  %s857_s4, 2048, %s37_s12, [#allocation5], %s773_s2, %s773_s2, %s774_s21  }
  0x23   :  { %765 = dma.done.wait [#allocation3], 4096  }
  0x24   :  { %766 = vsyncadd [#allocation3], 4294963200 }
  0x25   :  { %767 = dma.done.wait [#allocation5], 2048  }
  0x26   :  { %768 = vsyncadd [#allocation5], 4294965248  ;;  %v775_v0 = vmov 0.0   ;;  %v654_v1 = vld [vmem:[%s854_s1 + $0x4] ss:$8 sps:$4 sm:$0xff]   ;;  %vm59_vm0 = vcmask 130048   ;;  %v172_v58 = vlaneseq }
  0x27   :  { %127 = vmatprep.mubr.f32.mxu0 %v775_v0  ;;  %v656_v2 = vld [vmem:[%s854_s1] ss:$8 sps:$4 sm:$0xff]   ;;  %642 = vmatprep.subr.bf16.mxu0 %v654_v1  ;;  %v657_v4 = vld [vmem:[#allocation2 + $0x4] ss:$8 sps:$4 sm:$0xff]   ;;  %v660_v6 = vld [vmem:[#allocation2 + $0x14] ss:$8 sps:$4 sm:$0xff]  }
  0x28   :  { %v52_v3 = vld [vmem:[%s853_s0] sm:$0xff]  ;;  %644 = vmatpush1.bf16.msra.mxu0 %v656_v2  ;;  %342 = vmatprep.subr.bf16.mxu1 %v657_v4  ;;  %v662_v7 = vld [vmem:[#allocation2 + $0x10] ss:$8 sps:$4 sm:$0xff]   ;;  %v666_v10 = vld [vmem:[#allocation2 + $0x34] ss:$8 sps:$4 sm:$0xff]   ;;  %v173_v59 = vshrl.u32 %v172_v58, 7 }
  0x29   :  { %v659_v5 = vld [vmem:[#allocation2] ss:$8 sps:$4 sm:$0xff]   ;;  %v663_v8 = vld [vmem:[#allocation2 + $0x24] ss:$8 sps:$4 sm:$0xff]   ;;  %v668_v11 = vld [vmem:[#allocation2 + $0x30] ss:$8 sps:$4 sm:$0xff]  }
  0x2a   :  { %343 = vmatpush1.bf16.msra.mxu1 %v659_v5  ;;  %v665_v9 = vld [vmem:[#allocation2 + $0x20] ss:$8 sps:$4 sm:$0xff]   ;;  %v669_v12 = vld [vmem:[#allocation2 + $0x44] ss:$8 sps:$4 sm:$0xff]   ;;  %v672_v14 = vld [vmem:[#allocation2 + $0x54] ss:$8 sps:$4 sm:$0xff]  }
  0x2b   :  { %569 = vmatmul.mubr.msk.f32.vlgmr.msra.gmra.mrb[0].mxu0 %vm59_vm0, %v52_v3  ;;  %344 = vmatprep.subr.bf16.mxu1 %v660_v6  ;;  %v671_v13 = vld [vmem:[#allocation2 + $0x40] ss:$8 sps:$4 sm:$0xff]   ;;  %v674_v15 = vld [vmem:[#allocation2 + $0x50] ss:$8 sps:$4 sm:$0xff]   ;;  %v675_v16 = vld [vmem:[#allocation2 + $0x64] ss:$8 sps:$4 sm:$0xff]  }
  0x2c   :  { %v677_v17 = vld [vmem:[#allocation2 + $0x60] ss:$8 sps:$4 sm:$0xff]   ;;  %v678_v18 = vld [vmem:[#allocation2 + $0x74] ss:$8 sps:$4 sm:$0xff]   ;;  %v680_v19 = vld [vmem:[#allocation2 + $0x70] ss:$8 sps:$4 sm:$0xff]  }
  0x2d   :  { %v681_v20 = vld [vmem:[#allocation2 + $0x84] ss:$8 sps:$4 sm:$0xff]   ;;  %v683_v21 = vld [vmem:[#allocation2 + $0x80] ss:$8 sps:$4 sm:$0xff]   ;;  %v684_v22 = vld [vmem:[#allocation2 + $0x94] ss:$8 sps:$4 sm:$0xff]  }
  0x2e   :  { %345 = vmatpush1.bf16.msra.mxu1 %v662_v7  ;;  %v686_v23 = vld [vmem:[#allocation2 + $0x90] ss:$8 sps:$4 sm:$0xff]   ;;  %v687_v24 = vld [vmem:[#allocation2 + $0xa4] ss:$8 sps:$4 sm:$0xff]   ;;  %v689_v25 = vld [vmem:[#allocation2 + $0xa0] ss:$8 sps:$4 sm:$0xff]  }
  0x2f   :  { %346 = vmatprep.subr.bf16.mxu1 %v663_v8  ;;  %v690_v26 = vld [vmem:[#allocation2 + $0xb4] ss:$8 sps:$4 sm:$0xff]   ;;  %v692_v27 = vld [vmem:[#allocation2 + $0xb0] ss:$8 sps:$4 sm:$0xff]   ;;  %v693_v28 = vld [vmem:[#allocation2 + $0xc4] ss:$8 sps:$4 sm:$0xff]  }
  0x30   :  { %v695_v29 = vld [vmem:[#allocation2 + $0xc0] ss:$8 sps:$4 sm:$0xff]   ;;  %v696_v30 = vld [vmem:[#allocation2 + $0xd4] ss:$8 sps:$4 sm:$0xff]   ;;  %v698_v31 = vld [vmem:[#allocation2 + $0xd0] ss:$8 sps:$4 sm:$0xff]  }
  0x31   :  { %v699_v32 = vld [vmem:[#allocation2 + $0xe4] ss:$8 sps:$4 sm:$0xff]   ;;  %v701_v33 = vld [vmem:[#allocation2 + $0xe0] ss:$8 sps:$4 sm:$0xff]   ;;  %v702_v34 = vld [vmem:[#allocation2 + $0xf4] ss:$8 sps:$4 sm:$0xff]  }
  0x32   :  { %347 = vmatpush1.bf16.msra.mxu1 %v665_v9  ;;  %v704_v35 = vld [vmem:[#allocation2 + $0xf0] ss:$8 sps:$4 sm:$0xff]   ;;  %v705_v36 = vld [vmem:[#allocation4 + $0x40] sm:$0xff]   ;;  %v707_v38 = vld [vmem:[#allocation4 + $0x48] sm:$0xff]   ;;  %v174_v60 = vsub.s32 0, %v173_v59  ;;  %v178_v62 = vsub.s32 1, %v173_v59 }
  0x33   :  { %348 = vmatprep.subr.bf16.mxu1 %v666_v10  ;;  %v706_v37 = vld [vmem:[#allocation4] sm:$0xff]   ;;  %619 = vmatprep.subr.bf16.mxu0 %v705_v36  ;;  %v708_v39 = vld [vmem:[#allocation4 + $0x8] sm:$0xff]   ;;  %v709_v40 = vld [vmem:[#allocation4 + $0x50] sm:$0xff]  }
  0x34   :  { %620 = vmatpush3.bf16.msra.mxu0 %v706_v37  ;;  %v710_v41 = vld [vmem:[#allocation4 + $0x10] sm:$0xff]   ;;  %v711_v42 = vld [vmem:[#allocation4 + $0x58] sm:$0xff]   ;;  %v713_v44 = vld [vmem:[#allocation4 + $0x60] sm:$0xff]  }
  0x35   :  { %621 = vmatprep.subr.bf16.mxu0 %v707_v38  ;;  %v712_v43 = vld [vmem:[#allocation4 + $0x18] sm:$0xff]   ;;  %v714_v45 = vld [vmem:[#allocation4 + $0x20] sm:$0xff]   ;;  %v715_v46 = vld [vmem:[#allocation4 + $0x68] sm:$0xff]  }
  0x36   :  { %349 = vmatpush1.bf16.msra.mxu1 %v668_v11  ;;  %v716_v47 = vld [vmem:[#allocation4 + $0x28] sm:$0xff]   ;;  %v717_v54 = vld [vmem:[#allocation4 + $0x70] sm:$0xff]   ;;  %v719_v56 = vld [vmem:[#allocation4 + $0x78] sm:$0xff]  }
  0x37   :  { %350 = vmatprep.subr.bf16.mxu1 %v669_v12  ;;  %v718_v55 = vld [vmem:[#allocation4 + $0x30] sm:$0xff]   ;;  %v720_v57 = vld [vmem:[#allocation4 + $0x38] sm:$0xff]   ;;  %v170_v61 = vld [vmem:[%s856_s3] sm:$0x3] }
  0x38   :  { %622 = vmatpush3.bf16.msra.mxu0 %v708_v39  ;;  %v175_v63 = vrot.slane %v170_v61, %v174_v60  ;;  %v179_v0 = vrot.slane %v170_v61, %v178_v62  ;;  %v602_v12 = vld [vmem:[%s858_s5] ss:$0 sm:$0xff] }
  0x39   :  { %623 = vmatprep.subr.bf16.mxu0 %v709_v40 }
  0x3a   :  { %351 = vmatpush1.bf16.msra.mxu1 %v671_v13 }
  0x3b   :  { %352 = vmatprep.subr.bf16.mxu1 %v672_v14 }
  0x3c   :  { %624 = vmatpush3.bf16.msra.mxu0 %v710_v41 }
  0x3d   :  { %625 = vmatprep.subr.bf16.mxu0 %v711_v42 }
  0x3e   :  { %353 = vmatpush1.bf16.msra.mxu1 %v674_v15 }
  0x3f   :  { %354 = vmatprep.subr.bf16.mxu1 %v675_v16 }
  0x40   :  { %626 = vmatpush3.bf16.msra.mxu0 %v712_v43 }
  0x41   :  { %627 = vmatprep.subr.bf16.mxu0 %v713_v44 }
  0x42   :  { %355 = vmatpush1.bf16.msra.mxu1 %v677_v17 }
  0x43   :  { %356 = vmatprep.subr.bf16.mxu1 %v678_v18 }
  0x44   :  { %628 = vmatpush3.bf16.msra.mxu0 %v714_v45 }
  0x45   :  { %629 = vmatprep.subr.bf16.mxu0 %v715_v46 }
  0x46   :  { %357 = vmatpush1.bf16.msra.mxu1 %v680_v19 }
  0x47   :  { %358 = vmatprep.subr.bf16.mxu1 %v681_v20 }
  0x48   :  { %630 = vmatpush3.bf16.msra.mxu0 %v716_v47 }
  0x49   :  { %631 = vmatprep.subr.bf16.mxu0 %v717_v54 }
  0x4a   :  { %359 = vmatpush1.bf16.msra.mxu1 %v683_v21 }
  0x4b   :  { %360 = vmatprep.subr.bf16.mxu1 %v684_v22 }
  0x4c   :  { %632 = vmatpush3.bf16.msra.mxu0 %v718_v55 }
  0x4d   :  { %633 = vmatprep.subr.bf16.mxu0 %v719_v56 }
  0x4e   :  { %361 = vmatpush1.bf16.msra.mxu1 %v686_v23 }
  0x4f   :  { %362 = vmatprep.subr.bf16.mxu1 %v687_v24 }
  0x50   :  { %634 = vmatpush3.bf16.msra.mxu0 %v720_v57 }
  0x52   :  { %363 = vmatpush1.bf16.msra.mxu1 %v689_v25 }
  0x53   :  { %364 = vmatprep.subr.bf16.mxu1 %v690_v26 }
  0x56   :  { %365 = vmatpush1.bf16.msra.mxu1 %v692_v27 }
  0x57   :  { %366 = vmatprep.subr.bf16.mxu1 %v693_v28 }
  0x5a   :  { %367 = vmatpush1.bf16.msra.mxu1 %v695_v29 }
  0x5b   :  { %368 = vmatprep.subr.bf16.mxu1 %v696_v30 }
  0x5e   :  { %369 = vmatpush1.bf16.msra.mxu1 %v698_v31 }
  0x5f   :  { %370 = vmatprep.subr.bf16.mxu1 %v699_v32 }
  0x62   :  { %371 = vmatpush1.bf16.msra.mxu1 %v701_v33 }
  0x63   :  { %372 = vmatprep.subr.bf16.mxu1 %v702_v34 }
  0x66   :  { %373 = vmatpush1.bf16.msra.mxu1 %v704_v35 }
  0xfe   :  { %v129_v48 = vpop.f32.mrb[0].mxu0 }
  0xff   :  { %v134_v49 = vmax.f32 %v129_v48, 0.0  ;;  %v131_v50 = vpop.f32.mrb[1].mxu0 }
 0x100   :  { %v135_v51 = vmax.f32 %v131_v50, 0.0 }
 0x101   :  { %v136_v53 = vpack.c.bf16 %v134_v49, %v134_v49 }
 0x102   :  { %v137_v52 = vpack.c.bf16 %v135_v51, %v135_v51 }
 0x104   :  { %374 = vmatprep.mubr.bf16.mxu1 %v137_v52 }
 0x105   :  { %375 = vmatmul.mubr.bf16.vlgmr.msra.gmra.mrb[0].mxu1 %v136_v53 }
 0x1d8   :  { %v376_v1 = vpop.f32.mrb[0].mxu1 }
 0x1d9   :  { %v377_v2 = vadd.f32 %v376_v1, %v175_v63  ;;  %v378_v3 = vpop.f32.mrb[1].mxu1 }
 0x1da   :  { %v379_v4 = vadd.f32 %v378_v3, %v179_v0  ;;  %v380_v5 = vpop.f32.mrb[2].mxu1 }
 0x1db   :  { %v383_v6 = vmax.f32 %v377_v2, 0.0  ;;  %v381_v7 = vpop.f32.mrb[3].mxu1 }
 0x1dc   :  { %v384_v8 = vmax.f32 %v379_v4, 0.0 }
 0x1dd   :  { %v385_v10 = vpack.c.bf16 %v383_v6, %v383_v6 }
 0x1de   :  { %v386_v9 = vpack.c.bf16 %v384_v8, %v384_v8 }
 0x1e0   :  { %554 = vmatprep.mubr.bf16.mxu0 %v386_v9 }
 0x1e1   :  { %555 = vmatmul.mubr.bf16.vlgmr.msra.gmra.mrb[4].mxu0 %v385_v10 }
 0x2b4   :  { %v635_v11 = vpop.f32.mrb[4].mxu0 }
 0x2b5   :  { %v636_v13 = vpop.f32.mrb[5].mxu0 }
 0x2b6   :  { %v637_v14 = vadd.f32 %v636_v13, %v635_v11  ;;  %v638_v15 = vpop.f32.mrb[6].mxu0 }
 0x2b7   :  { %v639_v16 = vpop.f32.mrb[7].mxu0 }
 0x2b8   :  { %v557_v17 = vadd.f32 %v637_v14, %v602_v12 }
 0x2ba   :  { %562 = vst [vmem:[%s859_s6] sm:$0xff] %v557_v17 }
 0x2bb   :  { %567 = vsyncpa [#allocation3], 1 }
 0x2bc   :  { %568 = vsyncpa [#allocation5], 1 }

</bundles_post_ra>
